<compile_context>
chip_gen: v5e
topology: v5e:2x2
jax: 0.10.0
libtpu: 0.0.40
codegen_flags: <defaults>
</compile_context>

<pallas_src>
import jax
import jax.numpy as jnp
from jax.experimental import pallas as pl
from jax.experimental.pallas import tpu as pltpu


def _round_up(x, m):
    return (x + m - 1) // m * m


# Model architecture (fixed by the PyTorch module).
LAYER_SIZES = (4, 50, 100, 300, 100, 50, 3)

# Padded widths: input -> sublane multiple (8); hidden/output -> lane multiples (128).
D_PAD = (_round_up(LAYER_SIZES[0], 8),) + tuple(_round_up(d, 128) for d in LAYER_SIZES[1:])

W_ROWS = max(D_PAD[:-1])   # 384 : rows of the packed weight slab
W_COLS = sum(D_PAD[1:])    # 1024: columns of the packed weight / bias slabs

# Static, 128-aligned column offset of each layer inside the packed slabs.
_offs, _o = [], 0
for _d in D_PAD[1:]:
    _offs.append(_o)
    _o += _d
LAYER_OFFS = tuple(_offs)
NUM_LAYERS = len(LAYER_SIZES) - 1


def mlp_kernel(x_ref, w_ref, b_ref, out_ref):
    # x_ref  : (tile_b, 8)      f32   -- batch tile (pipelined over the grid)
    # w_ref  : (384, 1024)      bf16  -- all six weights, zero padded, VMEM resident
    # b_ref  : (1, 1024)        f32   -- all six biases,  zero padded, VMEM resident
    # out_ref: (tile_b, 128)    f32   -- lane-dense padded logits
    h = x_ref[...]                                   # f32 activations
    for l in range(NUM_LAYERS):                      # statically unrolled (6 layers)
        in_p, out_p, off = D_PAD[l], D_PAD[l + 1], LAYER_OFFS[l]
        w = w_ref[0:in_p, off:off + out_p]           # bf16, tile-aligned static slice
        b = b_ref[0:1, off:off + out_p]              # f32 (1, out_p) row
        # bf16 matmul operands, f32 MXU accumulation; bias add / ReLU stay f32.
        h = jnp.dot(h.astype(jnp.bfloat16), w, preferred_element_type=jnp.float32) + b
        if l < NUM_LAYERS - 1:
            h = jnp.maximum(h, 0.0)
    out_ref[...] = h.astype(out_ref.dtype)


def pack_params(params):
    """Pack six (W(in,out), b(1,out)) pairs into one bf16 weight slab + one f32 bias slab."""
    w_slab = jnp.zeros((W_ROWS, W_COLS), jnp.bfloat16)
    b_slab = jnp.zeros((1, W_COLS), jnp.float32)
    for l, (w, b) in enumerate(params):
        off = LAYER_OFFS[l]
        w_slab = w_slab.at[: w.shape[0], off:off + w.shape[1]].set(w.astype(jnp.bfloat16))
        b_slab = b_slab.at[:, off:off + b.shape[1]].set(b.astype(jnp.float32))
    return w_slab, b_slab


def classification_model_forward(x, params, *, max_tile_b=512):
    """x: (batch, 4) float32 ; params: list of (W_(in,out), b_(1,out)) pairs."""
    batch = x.shape[0]
    out_features = LAYER_SIZES[-1]

    w_slab, b_slab = pack_params(params)

    # Batch tile: small batches -> single grid step; large batches -> pipelined grid.
    tile_b = min(max_tile_b, _round_up(batch, 8))
    padded_batch = _round_up(batch, tile_b)
    grid = (padded_batch // tile_b,)

    # Pad x rows to the tile multiple and features 4 -> 8 (zero cols are no-ops).
    x_pad = jnp.zeros((padded_batch, D_PAD[0]), jnp.float32)
    x_pad = x_pad.at[:batch, : x.shape[1]].set(x.astype(jnp.float32))

    out_pad = pl.pallas_call(
        mlp_kernel,
        out_shape=jax.ShapeDtypeStruct((padded_batch, D_PAD[-1]), jnp.float32),
        grid=grid,
        in_specs=[
            pl.BlockSpec((tile_b, D_PAD[0]), lambda i: (i, 0)),   # x: tiled over batch
            pl.BlockSpec((W_ROWS, W_COLS), lambda i: (0, 0)),     # weights: fetched once
            pl.BlockSpec((1, W_COLS), lambda i: (0, 0)),          # biases:  fetched once
        ],
        out_specs=pl.BlockSpec((tile_b, D_PAD[-1]), lambda i: (i, 0)),
        compiler_params=pltpu.CompilerParams(
            dimension_semantics=("parallel",),   # shards batch tiles across TCs on v7x
        ),
    )(x_pad, w_slab, b_slab)

    return out_pad[:batch, :out_features]


def init_params(key, layer_sizes):
    """Deterministic init mimicking torch.nn.Linear default (uniform +-1/sqrt(fan_in))."""
    params = []
    for in_f, out_f in zip(layer_sizes[:-1], layer_sizes[1:]):
        key, kw, kb = jax.random.split(key, 3)
        bound = 1.0 / jnp.sqrt(jnp.float32(in_f))
        w = jax.random.uniform(kw, (in_f, out_f), jnp.float32, -bound, bound)
        b = jax.random.uniform(kb, (1, out_f), jnp.float32, -bound, bound)
        params.append((w, b))
    return params


def reference_forward(x, params):
    """Plain-JAX reference using the same bf16-operand / f32-accumulate math."""
    h = x.astype(jnp.float32)
    for i, (w, b) in enumerate(params):
        h = jnp.dot(h.astype(jnp.bfloat16), w.astype(jnp.bfloat16),
                    preferred_element_type=jnp.float32) + b
        if i < len(params) - 1:
            h = jnp.maximum(h, 0.0)
    return h


if __name__ == "__main__":
    key = jax.random.PRNGKey(0)

    input_size = LAYER_SIZES[0]    # iris: 4 features
    output_size = LAYER_SIZES[-1]  # 3 species classes

    kx, kp = jax.random.split(key)
    batch = 8
    x = jax.random.normal(kx, (batch, input_size), jnp.float32)
    params = init_params(kp, list(LAYER_SIZES))

    out = classification_model_forward(x, params)
    out = jax.block_until_ready(out)

    ref = reference_forward(x, params)
    assert out.shape == (batch, output_size)
    assert jnp.allclose(out, ref, atol=1e-2, rtol=1e-2), "mismatch vs JAX reference"

    print("KERNEL_OK")
</pallas_src>

<mosaic_0001>
module attributes {stable_mosaic.version = 11 : i64} {
  func.func @mlp_kernel(%arg0: i32, %arg1: memref<8x8xf32, #tpu.memory_space<vmem>>, %arg2: memref<384x1024xbf16, #tpu.memory_space<vmem>>, %arg3: memref<1x1024xf32, #tpu.memory_space<vmem>>, %arg4: memref<8x128xf32, #tpu.memory_space<vmem>>) attributes {dimension_semantics = [#tpu.dimension_semantics<parallel>], iteration_bounds = array<i64: 1>, scalar_prefetch = 0 : i64, scratch_operands = 0 : i64, tpu.core_type = #tpu.core_type<tc>, window_params = [{transform_indices = @transform_0, window_bounds = array<i64: 8, 8>}, {pipeline_mode = #tpu.pipeline_mode<synchronous>, transform_indices = @transform_1, window_bounds = array<i64: 384, 1024>}, {pipeline_mode = #tpu.pipeline_mode<synchronous>, transform_indices = @transform_2, window_bounds = array<i64: 1, 1024>}, {transform_indices = @transform_3, window_bounds = array<i64: 8, 128>}]} {
    %c0 = arith.constant 0 : index
    %c0_0 = arith.constant 0 : index
    %0 = vector.load %arg1[%c0, %c0_0] : memref<8x8xf32, #tpu.memory_space<vmem>>, vector<8x8xf32>
    %c0_1 = arith.constant 0 : index
    %c0_2 = arith.constant 0 : index
    %1 = vector.load %arg2[%c0_1, %c0_2] : memref<384x1024xbf16, #tpu.memory_space<vmem>>, vector<8x128xbf16>
    %c0_3 = arith.constant 0 : index
    %c0_4 = arith.constant 0 : index
    %2 = vector.load %arg3[%c0_3, %c0_4] : memref<1x1024xf32, #tpu.memory_space<vmem>>, vector<1x128xf32>
    %3 = arith.truncf %0 : vector<8x8xf32> to vector<8x8xbf16>
    %cst = arith.constant dense<0.000000e+00> : vector<8x128xf32>
    %4 = tpu.matmul %3, %1, %cst {dimension_numbers = #tpu.dot_dimension_numbers<[1], [0], [0], [1], [0, 0, 1, 1], [], []>} : vector<8x8xbf16>, vector<8x128xbf16>, vector<8x128xf32> -> vector<8x128xf32>
    %5 = vector.broadcast %2 : vector<1x128xf32> to vector<8x128xf32>
    %6 = arith.addf %4, %5 : vector<8x128xf32>
    %cst_5 = arith.constant 0.000000e+00 : f32
    %7 = vector.broadcast %cst_5 : f32 to vector<8x128xf32>
    %8 = arith.maximumf %6, %7 : vector<8x128xf32>
    %c0_6 = arith.constant 0 : index
    %c128 = arith.constant 128 : index
    %9 = vector.load %arg2[%c0_6, %c128] : memref<384x1024xbf16, #tpu.memory_space<vmem>>, vector<128x128xbf16>
    %c0_7 = arith.constant 0 : index
    %c128_8 = arith.constant 128 : index
    %10 = vector.load %arg3[%c0_7, %c128_8] : memref<1x1024xf32, #tpu.memory_space<vmem>>, vector<1x128xf32>
    %11 = arith.truncf %8 : vector<8x128xf32> to vector<8x128xbf16>
    %cst_9 = arith.constant dense<0.000000e+00> : vector<8x128xf32>
    %12 = tpu.matmul %11, %9, %cst_9 {dimension_numbers = #tpu.dot_dimension_numbers<[1], [0], [0], [1], [0, 0, 1, 1], [], []>} : vector<8x128xbf16>, vector<128x128xbf16>, vector<8x128xf32> -> vector<8x128xf32>
    %13 = vector.broadcast %10 : vector<1x128xf32> to vector<8x128xf32>
    %14 = arith.addf %12, %13 : vector<8x128xf32>
    %cst_10 = arith.constant 0.000000e+00 : f32
    %15 = vector.broadcast %cst_10 : f32 to vector<8x128xf32>
    %16 = arith.maximumf %14, %15 : vector<8x128xf32>
    %c0_11 = arith.constant 0 : index
    %c256 = arith.constant 256 : index
    %17 = vector.load %arg2[%c0_11, %c256] : memref<384x1024xbf16, #tpu.memory_space<vmem>>, vector<128x384xbf16>
    %c0_12 = arith.constant 0 : index
    %c256_13 = arith.constant 256 : index
    %18 = vector.load %arg3[%c0_12, %c256_13] : memref<1x1024xf32, #tpu.memory_space<vmem>>, vector<1x384xf32>
    %19 = arith.truncf %16 : vector<8x128xf32> to vector<8x128xbf16>
    %cst_14 = arith.constant dense<0.000000e+00> : vector<8x384xf32>
    %20 = tpu.matmul %19, %17, %cst_14 {dimension_numbers = #tpu.dot_dimension_numbers<[1], [0], [0], [1], [0, 0, 1, 1], [], []>} : vector<8x128xbf16>, vector<128x384xbf16>, vector<8x384xf32> -> vector<8x384xf32>
    %21 = vector.broadcast %18 : vector<1x384xf32> to vector<8x384xf32>
    %22 = arith.addf %20, %21 : vector<8x384xf32>
    %cst_15 = arith.constant 0.000000e+00 : f32
    %23 = vector.broadcast %cst_15 : f32 to vector<8x384xf32>
    %24 = arith.maximumf %22, %23 : vector<8x384xf32>
    %c0_16 = arith.constant 0 : index
    %c640 = arith.constant 640 : index
    %25 = vector.load %arg2[%c0_16, %c640] : memref<384x1024xbf16, #tpu.memory_space<vmem>>, vector<384x128xbf16>
    %c0_17 = arith.constant 0 : index
    %c640_18 = arith.constant 640 : index
    %26 = vector.load %arg3[%c0_17, %c640_18] : memref<1x1024xf32, #tpu.memory_space<vmem>>, vector<1x128xf32>
    %27 = arith.truncf %24 : vector<8x384xf32> to vector<8x384xbf16>
    %cst_19 = arith.constant dense<0.000000e+00> : vector<8x128xf32>
    %28 = tpu.matmul %27, %25, %cst_19 {dimension_numbers = #tpu.dot_dimension_numbers<[1], [0], [0], [1], [0, 0, 1, 1], [], []>} : vector<8x384xbf16>, vector<384x128xbf16>, vector<8x128xf32> -> vector<8x128xf32>
    %29 = vector.broadcast %26 : vector<1x128xf32> to vector<8x128xf32>
    %30 = arith.addf %28, %29 : vector<8x128xf32>
    %cst_20 = arith.constant 0.000000e+00 : f32
    %31 = vector.broadcast %cst_20 : f32 to vector<8x128xf32>
    %32 = arith.maximumf %30, %31 : vector<8x128xf32>
    %c0_21 = arith.constant 0 : index
    %c768 = arith.constant 768 : index
    %33 = vector.load %arg2[%c0_21, %c768] : memref<384x1024xbf16, #tpu.memory_space<vmem>>, vector<128x128xbf16>
    %c0_22 = arith.constant 0 : index
    %c768_23 = arith.constant 768 : index
    %34 = vector.load %arg3[%c0_22, %c768_23] : memref<1x1024xf32, #tpu.memory_space<vmem>>, vector<1x128xf32>
    %35 = arith.truncf %32 : vector<8x128xf32> to vector<8x128xbf16>
    %cst_24 = arith.constant dense<0.000000e+00> : vector<8x128xf32>
    %36 = tpu.matmul %35, %33, %cst_24 {dimension_numbers = #tpu.dot_dimension_numbers<[1], [0], [0], [1], [0, 0, 1, 1], [], []>} : vector<8x128xbf16>, vector<128x128xbf16>, vector<8x128xf32> -> vector<8x128xf32>
    %37 = vector.broadcast %34 : vector<1x128xf32> to vector<8x128xf32>
    %38 = arith.addf %36, %37 : vector<8x128xf32>
    %cst_25 = arith.constant 0.000000e+00 : f32
    %39 = vector.broadcast %cst_25 : f32 to vector<8x128xf32>
    %40 = arith.maximumf %38, %39 : vector<8x128xf32>
    %c0_26 = arith.constant 0 : index
    %c896 = arith.constant 896 : index
    %41 = vector.load %arg2[%c0_26, %c896] : memref<384x1024xbf16, #tpu.memory_space<vmem>>, vector<128x128xbf16>
    %c0_27 = arith.constant 0 : index
    %c896_28 = arith.constant 896 : index
    %42 = vector.load %arg3[%c0_27, %c896_28] : memref<1x1024xf32, #tpu.memory_space<vmem>>, vector<1x128xf32>
    %43 = arith.truncf %40 : vector<8x128xf32> to vector<8x128xbf16>
    %cst_29 = arith.constant dense<0.000000e+00> : vector<8x128xf32>
    %44 = tpu.matmul %43, %41, %cst_29 {dimension_numbers = #tpu.dot_dimension_numbers<[1], [0], [0], [1], [0, 0, 1, 1], [], []>} : vector<8x128xbf16>, vector<128x128xbf16>, vector<8x128xf32> -> vector<8x128xf32>
    %45 = vector.broadcast %42 : vector<1x128xf32> to vector<8x128xf32>
    %46 = arith.addf %44, %45 : vector<8x128xf32>
    %c0_30 = arith.constant 0 : index
    %c0_31 = arith.constant 0 : index
    %47 = vector.load %arg4[%c0_30, %c0_31] : memref<8x128xf32, #tpu.memory_space<vmem>>, vector<8x128xf32>
    tpu.vector_store %arg4[%c0_30, %c0_31], %46 {strides = array<i32>} : memref<8x128xf32, #tpu.memory_space<vmem>>, vector<8x128xf32>,
    return
  }
  func.func @transform_0(%arg0: i32) -> (i32, i32) {
    %c0_i32 = arith.constant 0 : i32
    %c0_i32_0 = arith.constant 0 : i32
    return %arg0, %c0_i32 : i32, i32
  }
  func.func @transform_1(%arg0: i32) -> (i32, i32) {
    %c0_i32 = arith.constant 0 : i32
    %c0_i32_0 = arith.constant 0 : i32
    %c0_i32_1 = arith.constant 0 : i32
    return %c0_i32, %c0_i32_0 : i32, i32
  }
  func.func @transform_2(%arg0: i32) -> (i32, i32) {
    %c0_i32 = arith.constant 0 : i32
    %c0_i32_0 = arith.constant 0 : i32
    %c0_i32_1 = arith.constant 0 : i32
    return %c0_i32, %c0_i32_0 : i32, i32
  }
  func.func @transform_3(%arg0: i32) -> (i32, i32) {
    %c0_i32 = arith.constant 0 : i32
    %c0_i32_0 = arith.constant 0 : i32
    return %arg0, %c0_i32 : i32, i32
  }
}

</mosaic_0001>

<bundles_post_ra>
// kernel: tpu_custom_call.1
= control target key start
LH: loop header
LB: loop body
LE: loop exit
PB: predicated region body
PF: predicated region fallthrough
CT: control target
= control target key end

     0   :  { %8 = vsyncpa [#allocation3], 0  ;;  %s1317_s0 = inlined_call_operand.hbm [shape: f32[8,8], index: 0, kind: input, shape index: {}]   ;;  %s1318_s1 = inlined_call_operand.hbm [shape: bf16[384,1024], index: 1, kind: input, shape index: {}]   ;;  %s1319_s2 = inlined_call_operand.hbm [shape: f32[1,1024], index: 2, kind: input, shape index: {}]   ;;  %s1320_s3 = inlined_call_operand.hbm [shape: f32[8,128], index: 3, kind: output, shape index: {}]  }
   0x1   :  { %9 = vsyncpa [#allocation6], 0  ;;  %s26_s14 = sshll.u32 %s1318_s1, 4  ;;  %s27_s14 = int_to_ptr.hbm [resolvable:$true] %s26_s14 }
   0x2   :  { %10 = vsyncpa [#allocation4], 0  ;;  %s1279_s15 = smov [#allocation5]   ;;  %s16_s19 = sshll.u32 %s1317_s0, 4  ;;  %s17_s19 = int_to_ptr.hbm [resolvable:$true] %s16_s19 }
   0x3   :  { %s28_s16 = sshll.u32 %s1279_s15, 4  ;;  %s1280_s20 = smov 512   ;;  %s29_s16 = int_to_ptr.vmem [resolvable:$true] %s28_s16 }
   0x4   :  { %s1281_s21 = smov 32   ;;  %s1282_s22 = smov [#allocation2]  }
   0x5   :  { %34 = dma.hbm_to_vmem [thread:$0]  %s27_s14, 24576, %s29_s16, [#allocation6], %s1280_s20, %s1280_s20, %s1281_s21  }
   0x6   :  { %s18_s23 = sshll.u32 %s1282_s22, 4  ;;  %s40_s26 = sshll.u32 %s1319_s2, 4  ;;  %s19_s23 = int_to_ptr.vmem [resolvable:$true] %s18_s23  ;;  %s41_s26 = int_to_ptr.hbm [resolvable:$true] %s40_s26 }
   0x7   :  { %21 = dma.hbm_to_vmem [thread:$0]  %s17_s19, 128, %s19_s23, [#allocation3]  }
   0x8   :  { %s1283_s1 = smov [#allocation7]  }
   0x9   :  { %s42_s27 = sshll.u32 %s1283_s1, 4  ;;  %s43_s27 = int_to_ptr.vmem [resolvable:$true] %s42_s27 }
   0xa   :  { %45 = dma.hbm_to_vmem [thread:$0]  %s41_s26, 128, %s43_s27, [#allocation6]  }
   0xb   :  { %1273 = dma.done.wait [#allocation3], 128  }
   0xc   :  { %1274 = vsyncadd [#allocation3], 4294967168 }
   0xd   :  { %1275 = dma.done.wait [#allocation6], 24704  }
   0xe   :  { %1276 = vsyncadd [#allocation6], 4294942592  ;;  %vm70_vm0 = vcmask 1043456   ;;  %v60_v0 = vld [vmem:[#allocation5] sm:$0xf]  ;;  %v59_v1 = vld [vmem:[#allocation2] sm:$0xff] }
   0xf   :  { %v836_v2 = vld [vmem:[#allocation5 + $0x1c4] sm:$0xf]  ;;  %v72_v3 = vsel %vm70_vm0, %v60_v0, 0  ;;  %v62_v4 = vpack.c.bf16 %v59_v1, %v59_v1  ;;  %vm66_vm1 = vcmask 64512   ;;  %v924_v28 = vld [vmem:[#allocation5 + $0x1c8] sm:$0xf] }
  0x10   :  { %v1101_v5 = vld [vmem:[#allocation5 + $0x1e0] sm:$0xf0]  ;;  %81 = vmatpush.bf16.msra.mxu0 %v72_v3  ;;  %v1124_v29 = vld [vmem:[#allocation5 + $0x1e4] sm:$0xf0]  ;;  %v1123_v30 = vld [vmem:[#allocation5 + $0x1cc] sm:$0xf] }
  0x11   :  { %v832_v6 = vld [vmem:[#allocation5 + $0x184] sm:$0xf]  ;;  %v837_v7 = vor.u32 %v1101_v5, %v836_v2  ;;  %v925_v31 = vor.u32 %v1124_v29, %v924_v28  ;;  %v926_v32 = vld [vmem:[#allocation5 + $0x1e8] sm:$0xf0]  ;;  %v932_v33 = vld [vmem:[#allocation5 + $0x1d0] sm:$0xf] }
  0x12   :  { %v1100_v8 = vld [vmem:[#allocation5 + $0x1a0] sm:$0xf0]  ;;  %v1125_v34 = vld [vmem:[#allocation5 + $0x1ec] sm:$0xf0]  ;;  %v929_v35 = vor.u32 %v1123_v30, %v926_v32  ;;  %v912_v37 = vld [vmem:[#allocation5 + $0x188] sm:$0xf] }
  0x13   :  { %157 = vmatpush.bf16.msra.mxu1 %v837_v7  ;;  %v833_v9 = vor.u32 %v1100_v8, %v832_v6  ;;  %v828_v10 = vld [vmem:[#allocation5 + $0x144] sm:$0xf]  ;;  %805 = vmatmul.msk.bf16.vlgmr.msra.gmra.mxu0 %vm66_vm1, %v62_v4  ;;  %v933_v36 = vor.u32 %v1125_v34, %v932_v33  ;;  %v1121_v38 = vld [vmem:[#allocation5 + $0x1a4] sm:$0xf0]  ;;  %v1120_v39 = vld [vmem:[#allocation5 + $0x18c] sm:$0xf] }
  0x14   :  { %v1099_v11 = vld [vmem:[#allocation5 + $0x160] sm:$0xf0]  ;;  %340 = vmatpush.bf16.msra.mxu2 %v925_v31  ;;  %v913_v40 = vor.u32 %v1121_v38, %v912_v37  ;;  %v914_v41 = vld [vmem:[#allocation5 + $0x1a8] sm:$0xf0]  ;;  %v920_v42 = vld [vmem:[#allocation5 + $0x190] sm:$0xf]  ;;  %353 = vmatpush.bf16.msra.mxu3 %v929_v35 }
  0x15   :  { %v829_v12 = vor.u32 %v1099_v11, %v828_v10  ;;  %v824_v13 = vld [vmem:[#allocation5 + $0x104] sm:$0xf]  ;;  %v1122_v43 = vld [vmem:[#allocation5 + $0x1ac] sm:$0xf0]  ;;  %366 = vmatpush.bf16.msrb.mxu0 %v933_v36  ;;  %v917_v44 = vor.u32 %v1120_v39, %v914_v41  ;;  %v900_v46 = vld [vmem:[#allocation5 + $0x148] sm:$0xf] }
  0x16   :  { %v1098_v14 = vld [vmem:[#allocation5 + $0x120] sm:$0xf0]  ;;  %v921_v45 = vor.u32 %v1122_v43, %v920_v42  ;;  %v1118_v47 = vld [vmem:[#allocation5 + $0x164] sm:$0xf0]  ;;  %v1117_v48 = vld [vmem:[#allocation5 + $0x14c] sm:$0xf] }
  0x17   :  { %158 = vmatpush.bf16.msra.mxu1 %v833_v9  ;;  %v825_v15 = vor.u32 %v1098_v14, %v824_v13  ;;  %v820_v16 = vld [vmem:[#allocation5 + $0xc4] sm:$0xf]  ;;  %v902_v49 = vld [vmem:[#allocation5 + $0x168] sm:$0xf0]  ;;  %v908_v50 = vld [vmem:[#allocation5 + $0x150] sm:$0xf]  ;;  %v901_v52 = vor.u32 %v1118_v47, %v900_v46 }
  0x18   :  { %v1097_v17 = vld [vmem:[#allocation5 + $0xe0] sm:$0xf0]  ;;  %v1119_v51 = vld [vmem:[#allocation5 + $0x16c] sm:$0xf0]  ;;  %341 = vmatpush.bf16.msra.mxu2 %v913_v40  ;;  %354 = vmatpush.bf16.msra.mxu3 %v917_v44  ;;  %v905_v53 = vor.u32 %v1117_v48, %v902_v49  ;;  %v888_v55 = vld [vmem:[#allocation5 + $0x108] sm:$0xf] }
  0x19   :  { %v821_v18 = vor.u32 %v1097_v17, %v820_v16  ;;  %v816_v19 = vld [vmem:[#allocation5 + $0x84] sm:$0xf]  ;;  %367 = vmatpush.bf16.msrb.mxu0 %v921_v45  ;;  %v909_v54 = vor.u32 %v1119_v51, %v908_v50  ;;  %v1115_v56 = vld [vmem:[#allocation5 + $0x124] sm:$0xf0]  ;;  %v1114_v57 = vld [vmem:[#allocation5 + $0x10c] sm:$0xf] }
  0x1a   :  { %v1096_v20 = vld [vmem:[#allocation5 + $0xa0] sm:$0xf0]  ;;  %v890_v58 = vld [vmem:[#allocation5 + $0x128] sm:$0xf0]  ;;  %v896_v59 = vld [vmem:[#allocation5 + $0x110] sm:$0xf]  ;;  %v889_v61 = vor.u32 %v1115_v56, %v888_v55 }
  0x1b   :  { %159 = vmatpush.bf16.msra.mxu1 %v829_v12  ;;  %v817_v21 = vor.u32 %v1096_v20, %v816_v19  ;;  %v812_v22 = vld [vmem:[#allocation5 + $0x44] sm:$0xf]  ;;  %v1116_v60 = vld [vmem:[#allocation5 + $0x12c] sm:$0xf0]  ;;  %v893_v62 = vor.u32 %v1114_v57, %v890_v58  ;;  %v876_v0 = vld [vmem:[#allocation5 + $0xc8] sm:$0xf] }
  0x1c   :  { %v1095_v23 = vld [vmem:[#allocation5 + $0x60] sm:$0xf0]  ;;  %342 = vmatpush.bf16.msra.mxu2 %v901_v52  ;;  %355 = vmatpush.bf16.msra.mxu3 %v905_v53  ;;  %v897_v63 = vor.u32 %v1116_v60, %v896_v59  ;;  %v1112_v1 = vld [vmem:[#allocation5 + $0xe4] sm:$0xf0]  ;;  %v1111_v2 = vld [vmem:[#allocation5 + $0xcc] sm:$0xf] }
  0x1d   :  { %v813_v24 = vor.u32 %v1095_v23, %v812_v22  ;;  %v808_v25 = vld [vmem:[#allocation5 + $0x4] sm:$0xf]  ;;  %368 = vmatpush.bf16.msrb.mxu0 %v909_v54  ;;  %v878_v3 = vld [vmem:[#allocation5 + $0xe8] sm:$0xf0]  ;;  %v884_v4 = vld [vmem:[#allocation5 + $0xd0] sm:$0xf]  ;;  %v877_v6 = vor.u32 %v1112_v1, %v876_v0 }
  0x1e   :  { %v1094_v26 = vld [vmem:[#allocation5 + $0x20] sm:$0xf0]  ;;  %v1113_v5 = vld [vmem:[#allocation5 + $0xec] sm:$0xf0]  ;;  %v881_v7 = vor.u32 %v1111_v2, %v878_v3  ;;  %v864_v9 = vld [vmem:[#allocation5 + $0x88] sm:$0xf] }
  0x1f   :  { %160 = vmatpush.bf16.msra.mxu1 %v825_v15  ;;  %v809_v27 = vor.u32 %v1094_v26, %v808_v25  ;;  %v885_v8 = vor.u32 %v1113_v5, %v884_v4  ;;  %v1109_v10 = vld [vmem:[#allocation5 + $0xa4] sm:$0xf0]  ;;  %v1108_v11 = vld [vmem:[#allocation5 + $0x8c] sm:$0xf]  ;;  %v872_v13 = vld [vmem:[#allocation5 + $0x90] sm:$0xf] }
  0x20   :  { %343 = vmatpush.bf16.msra.mxu2 %v889_v61  ;;  %356 = vmatpush.bf16.msra.mxu3 %v893_v62  ;;  %v866_v12 = vld [vmem:[#allocation5 + $0xa8] sm:$0xf0]  ;;  %v1110_v14 = vld [vmem:[#allocation5 + $0xac] sm:$0xf0]  ;;  %v865_v15 = vor.u32 %v1109_v10, %v864_v9  ;;  %v1106_v25 = vld [vmem:[#allocation5 + $0x64] sm:$0xf0] }
  0x21   :  { %369 = vmatpush.bf16.msrb.mxu0 %v897_v63  ;;  %v869_v16 = vor.u32 %v1108_v11, %v866_v12  ;;  %v873_v17 = vor.u32 %v1110_v14, %v872_v13  ;;  %v1105_v26 = vld [vmem:[#allocation5 + $0x4c] sm:$0xf]  ;;  %v860_v29 = vld [vmem:[#allocation5 + $0x50] sm:$0xf]  ;;  %v840_v33 = vld [vmem:[#allocation5 + $0x8] sm:$0xf] }
  0x22   :  { %v854_v28 = vld [vmem:[#allocation5 + $0x68] sm:$0xf0]  ;;  %v1107_v30 = vld [vmem:[#allocation5 + $0x6c] sm:$0xf0]  ;;  %v1103_v34 = vld [vmem:[#allocation5 + $0x24] sm:$0xf0] }
  0x23   :  { %161 = vmatpush.bf16.msra.mxu1 %v821_v18  ;;  %v1172_v18 = vld [vmem:[#allocation7] ss:$0 sm:$0xff]  ;;  %v857_v31 = vor.u32 %v1105_v26, %v854_v28  ;;  %v861_v32 = vor.u32 %v1107_v30, %v860_v29  ;;  %v1102_v35 = vld [vmem:[#allocation5 + $0xc] sm:$0xf]  ;;  %v841_v36 = vor.u32 %v1103_v34, %v840_v33  ;;  %v848_v38 = vld [vmem:[#allocation5 + $0x10] sm:$0xf] }
  0x24   :  { %344 = vmatpush.bf16.msra.mxu2 %v877_v6  ;;  %357 = vmatpush.bf16.msra.mxu3 %v881_v7  ;;  %v842_v37 = vld [vmem:[#allocation5 + $0x28] sm:$0xf0]  ;;  %v1104_v39 = vld [vmem:[#allocation5 + $0x2c] sm:$0xf0]  ;;  %v1028_v42 = vld [vmem:[#allocation5 + $0x5d4] sm:$0xf] }
  0x25   :  { %370 = vmatpush.bf16.msrb.mxu0 %v885_v8  ;;  %v845_v40 = vor.u32 %v1102_v35, %v842_v37  ;;  %v849_v41 = vor.u32 %v1104_v39, %v848_v38  ;;  %v1149_v43 = vld [vmem:[#allocation5 + $0x5f0] sm:$0xf0]  ;;  %v1173_v26 = vld [vmem:[#allocation7 + $0x1] ss:$0 sm:$0xff]  ;;  %s1284_s0 = smov [#allocation8]   ;;  %s794_s30 = sshll.u32 %s1320_s3, 4  ;;  %s795_s30 = int_to_ptr.hbm [resolvable:$true] %s794_s30 }
  0x26   :  { %v1024_v44 = vld [vmem:[#allocation5 + $0x594] sm:$0xf]  ;;  %v1029_v45 = vor.u32 %v1149_v43, %v1028_v42  ;;  %s792_s2 = sshll.u32 %s1284_s0, 4  ;;  %s793_s2 = int_to_ptr.vmem [resolvable:$true] %s792_s2 }
  0x27   :  { %162 = vmatpush.bf16.msra.mxu1 %v817_v21  ;;  %v1148_v46 = vld [vmem:[#allocation5 + $0x5b0] sm:$0xf0] }
  0x28   :  { %345 = vmatpush.bf16.msra.mxu2 %v865_v15  ;;  %358 = vmatpush.bf16.msra.mxu3 %v869_v16  ;;  %v964_v47 = vld [vmem:[#allocation5 + $0x1d4] sm:$0xf]  ;;  %v1025_v52 = vor.u32 %v1148_v46, %v1024_v44 }
  0x29   :  { %371 = vmatpush.bf16.msrb.mxu0 %v873_v17  ;;  %v1133_v48 = vld [vmem:[#allocation5 + $0x1f0] sm:$0xf0] }
  0x2a   :  { %v965_v49 = vor.u32 %v1133_v48, %v964_v47  ;;  %v996_v50 = vld [vmem:[#allocation5 + $0x3d4] sm:$0xf] }
  0x2b   :  { %163 = vmatpush.bf16.msra.mxu1 %v813_v24  ;;  %v852_v24 = vld [vmem:[#allocation5 + $0x48] sm:$0xf]  ;;  %v1141_v51 = vld [vmem:[#allocation5 + $0x3f0] sm:$0xf0] }
  0x2c   :  { %359 = vmatpush.bf16.msra.mxu3 %v857_v31  ;;  %v997_v53 = vor.u32 %v1141_v51, %v996_v50  ;;  %v1020_v54 = vld [vmem:[#allocation5 + $0x554] sm:$0xf] }
  0x2d   :  { %372 = vmatpush.bf16.msrb.mxu0 %v861_v32  ;;  %v960_v55 = vld [vmem:[#allocation5 + $0x194] sm:$0xf] }
  0x2e   :  { %v1132_v56 = vld [vmem:[#allocation5 + $0x1b0] sm:$0xf0] }
  0x2f   :  { %164 = vmatpush.bf16.msra.mxu1 %v809_v27  ;;  %v853_v27 = vor.u32 %v1106_v25, %v852_v24  ;;  %v1147_v57 = vld [vmem:[#allocation5 + $0x570] sm:$0xf0]  ;;  %v961_v58 = vor.u32 %v1132_v56, %v960_v55  ;;  %v1060_v56 = vld [vmem:[#allocation5 + $0x1d8] sm:$0xf] }
  0x30   :  { %360 = vmatpush.bf16.msra.mxu3 %v845_v40  ;;  %v992_v59 = vld [vmem:[#allocation5 + $0x394] sm:$0xf]  ;;  %v1021_v2 = vor.u32 %v1147_v57, %v1020_v54  ;;  %v1157_v57 = vld [vmem:[#allocation5 + $0x1f4] sm:$0xf0] }
  0x31   :  { %346 = vmatpush.bf16.msra.mxu2 %v853_v27  ;;  %373 = vmatpush.bf16.msrb.mxu0 %v849_v41  ;;  %v1140_v60 = vld [vmem:[#allocation5 + $0x3b0] sm:$0xf0] }
  0x32   :  { %v993_v61 = vor.u32 %v1140_v60, %v992_v59  ;;  %v956_v62 = vld [vmem:[#allocation5 + $0x154] sm:$0xf]  ;;  %v1061_v59 = vor.u32 %v1157_v57, %v1060_v56  ;;  %v1156_v60 = vld [vmem:[#allocation5 + $0x1b4] sm:$0xf0] }
  0x33   :  { %581 = vmatpush.bf16.msrb.mxu1 %v965_v49  ;;  %v1131_v63 = vld [vmem:[#allocation5 + $0x170] sm:$0xf0] }
  0x34   :  { %607 = vmatpush.bf16.msrb.mxu3 %v1029_v45  ;;  %v988_v0 = vld [vmem:[#allocation5 + $0x354] sm:$0xf]  ;;  %v957_v5 = vor.u32 %v1131_v63, %v956_v62  ;;  %v1052_v62 = vld [vmem:[#allocation5 + $0x158] sm:$0xf] }
  0x35   :  { %347 = vmatpush.bf16.msra.mxu2 %v841_v36  ;;  %v1139_v1 = vld [vmem:[#allocation5 + $0x370] sm:$0xf0]  ;;  %690 = vmatpush.bf16.msra.mxu0 %v1061_v59  ;;  %v1155_v63 = vld [vmem:[#allocation5 + $0x174] sm:$0xf0] }
  0x36   :  { %v1016_v3 = vld [vmem:[#allocation5 + $0x514] sm:$0xf]  ;;  %v989_v6 = vor.u32 %v1139_v1, %v988_v0  ;;  %v1053_v0 = vor.u32 %v1155_v63, %v1052_v62  ;;  %v1048_v1 = vld [vmem:[#allocation5 + $0x118] sm:$0xf] }
  0x37   :  { %582 = vmatpush.bf16.msrb.mxu1 %v961_v58  ;;  %v1146_v4 = vld [vmem:[#allocation5 + $0x530] sm:$0xf0]  ;;  %v1056_v58 = vld [vmem:[#allocation5 + $0x198] sm:$0xf] }
  0x38   :  { %608 = vmatpush.bf16.msrb.mxu3 %v1025_v52  ;;  %v952_v7 = vld [vmem:[#allocation5 + $0x114] sm:$0xf]  ;;  %v1017_v11 = vor.u32 %v1146_v4, %v1016_v3  ;;  %v203_v4 = vld [vmem:[#allocation7 + $0x2] sm:$0x7] }
  0x39   :  { %594 = vmatpush.bf16.msrb.mxu2 %v997_v53  ;;  %v1130_v8 = vld [vmem:[#allocation5 + $0x130] sm:$0xf0] }
  0x3a   :  { %v984_v9 = vld [vmem:[#allocation5 + $0x314] sm:$0xf]  ;;  %v953_v14 = vor.u32 %v1130_v8, %v952_v7  ;;  %v206_v8 = vperm.slane %v203_v4, 0 }
  0x3b   :  { %v1138_v10 = vld [vmem:[#allocation5 + $0x330] sm:$0xf0]  ;;  %583 = vmatpush.bf16.msrb.mxu1 %v957_v5  ;;  %v208_v5 = vperm.slane %v203_v4, 2 }
  0x3c   :  { %609 = vmatpush.bf16.msrb.mxu3 %v1021_v2  ;;  %v1012_v12 = vld [vmem:[#allocation5 + $0x4d4] sm:$0xf]  ;;  %v985_v15 = vor.u32 %v1138_v10, %v984_v9  ;;  %v1154_v2 = vld [vmem:[#allocation5 + $0x134] sm:$0xf0]  ;;  %v207_v9 = vperm.slane %v203_v4, 1 }
  0x3d   :  { %595 = vmatpush.bf16.msrb.mxu2 %v993_v61  ;;  %v1145_v13 = vld [vmem:[#allocation5 + $0x4f0] sm:$0xf0]  ;;  %v1057_v61 = vor.u32 %v1156_v60, %v1056_v58  ;;  %v1049_v3 = vor.u32 %v1154_v2, %v1048_v1  ;;  %v1068_v1 = vld [vmem:[#allocation5 + $0x5c] sm:$0xf] }
  0x3e   :  { %v948_v16 = vld [vmem:[#allocation5 + $0xd4] sm:$0xf]  ;;  %v1159_v2 = vld [vmem:[#allocation5 + $0x78] sm:$0xf0] }
  0x3f   :  { %v1129_v17 = vld [vmem:[#allocation5 + $0xf0] sm:$0xf0]  ;;  %584 = vmatpush.bf16.msrb.mxu1 %v953_v14  ;;  %691 = vmatpush.bf16.msra.mxu0 %v1057_v61  ;;  %v1064_v4 = vld [vmem:[#allocation5 + $0x1c] sm:$0xf] }
  0x40   :  { %610 = vmatpush.bf16.msrb.mxu3 %v1017_v11  ;;  %v1004_v32 = vld [vmem:[#allocation5 + $0x454] sm:$0xf] }
  0x41   :  { %596 = vmatpush.bf16.msrb.mxu2 %v989_v6  ;;  %v1143_v33 = vld [vmem:[#allocation5 + $0x470] sm:$0xf0] }
  0x42   :  { %v1005_v34 = vor.u32 %v1143_v33, %v1004_v32  ;;  %v944_v35 = vld [vmem:[#allocation5 + $0x94] sm:$0xf]  ;;  %v1032_v32 = vld [vmem:[#allocation5 + $0x18] sm:$0xf] }
  0x43   :  { %v1128_v36 = vld [vmem:[#allocation5 + $0xb0] sm:$0xf0]  ;;  %692 = vmatpush.bf16.msra.mxu0 %v1053_v0  ;;  %v1150_v33 = vld [vmem:[#allocation5 + $0x34] sm:$0xf0] }
  0x44   :  { %v976_v37 = vld [vmem:[#allocation5 + $0x294] sm:$0xf]  ;;  %v945_v38 = vor.u32 %v1128_v36, %v944_v35  ;;  %v1092_v35 = vld [vmem:[#allocation5 + $0x1dc] sm:$0xf] }
  0x45   :  { %597 = vmatpush.bf16.msrb.mxu2 %v985_v15  ;;  %v1136_v39 = vld [vmem:[#allocation5 + $0x2b0] sm:$0xf0]  ;;  %v1165_v36 = vld [vmem:[#allocation5 + $0x1f8] sm:$0xf0] }
  0x46   :  { %v977_v40 = vor.u32 %v1136_v39, %v976_v37  ;;  %v1000_v41 = vld [vmem:[#allocation5 + $0x414] sm:$0xf]  ;;  %v1088_v37 = vld [vmem:[#allocation5 + $0x19c] sm:$0xf] }
  0x47   :  { %v1142_v42 = vld [vmem:[#allocation5 + $0x430] sm:$0xf0]  ;;  %693 = vmatpush.bf16.msra.mxu0 %v1049_v3  ;;  %v1164_v39 = vld [vmem:[#allocation5 + $0x1b8] sm:$0xf0]  ;;  %v1069_v3 = vor.u32 %v1159_v2, %v1068_v1 }
  0x48   :  { %v1001_v43 = vor.u32 %v1142_v42, %v1000_v41  ;;  %v940_v44 = vld [vmem:[#allocation5 + $0x54] sm:$0xf]  ;;  %v1084_v41 = vld [vmem:[#allocation5 + $0x15c] sm:$0xf] }
  0x49   :  { %v1127_v45 = vld [vmem:[#allocation5 + $0x70] sm:$0xf0]  ;;  %v1163_v42 = vld [vmem:[#allocation5 + $0x178] sm:$0xf0] }
  0x4a   :  { %v972_v46 = vld [vmem:[#allocation5 + $0x254] sm:$0xf]  ;;  %v941_v47 = vor.u32 %v1127_v45, %v940_v44  ;;  %v1080_v44 = vld [vmem:[#allocation5 + $0x11c] sm:$0xf] }
  0x4b   :  { %v1135_v48 = vld [vmem:[#allocation5 + $0x270] sm:$0xf0]  ;;  %v1162_v45 = vld [vmem:[#allocation5 + $0x138] sm:$0xf0] }
  0x4c   :  { %v973_v49 = vor.u32 %v1135_v48, %v972_v46  ;;  %v936_v50 = vld [vmem:[#allocation5 + $0x14] sm:$0xf]  ;;  %v1081_v46 = vor.u32 %v1162_v45, %v1080_v44  ;;  %v1161_v48 = vld [vmem:[#allocation5 + $0xf8] sm:$0xf0] }
  0x4d   :  { %v1126_v51 = vld [vmem:[#allocation5 + $0x30] sm:$0xf0] }
  0x4e   :  { %v968_v52 = vld [vmem:[#allocation5 + $0x214] sm:$0xf]  ;;  %v937_v53 = vor.u32 %v1126_v51, %v936_v50  ;;  %v1072_v50 = vld [vmem:[#allocation5 + $0x9c] sm:$0xf] }
  0x4f   :  { %v1134_v54 = vld [vmem:[#allocation5 + $0x230] sm:$0xf0]  ;;  %v1160_v51 = vld [vmem:[#allocation5 + $0xb8] sm:$0xf0] }
  0x50   :  { %v969_v55 = vor.u32 %v1134_v54, %v968_v52 }
  0x90   :  { %v83_v19 = vpop.f32.mrf.mxu0 }
  0x91   :  { %v84_v20 = vadd.f32 %v1172_v18, %v83_v19  ;;  %v980_v18 = vld [vmem:[#allocation5 + $0x2d4] sm:$0xf] }
  0x92   :  { %v1137_v19 = vld [vmem:[#allocation5 + $0x2f0] sm:$0xf0] }
  0x93   :  { %v87_v21 = vmax.f32 %v84_v20, 0.0  ;;  %v1013_v20 = vor.u32 %v1145_v13, %v1012_v12  ;;  %v981_v24 = vor.u32 %v1137_v19, %v980_v18 }
  0x95   :  { %v105_v22 = vpack.c.bf16 %v87_v21, %v87_v21  ;;  %v1008_v21 = vld [vmem:[#allocation5 + $0x494] sm:$0xf]  ;;  %611 = vmatpush.bf16.msrb.mxu3 %v1013_v20  ;;  %598 = vmatpush.bf16.msrb.mxu2 %v981_v24  ;;  %v1153_v24 = vld [vmem:[#allocation5 + $0xf4] sm:$0xf0] }
  0x97   :  { %165 = vmatmul.bf16.vlgmr.msra.gmra.mxu1 %v105_v22  ;;  %v1144_v22 = vld [vmem:[#allocation5 + $0x4b0] sm:$0xf0] }
  0x98   :  { %v85_v23 = vpop.f32.mrf.mxu0  ;;  %v1009_v25 = vor.u32 %v1144_v22, %v1008_v21 }
  0x99   :  { %v949_v23 = vor.u32 %v1129_v17, %v948_v16  ;;  %599 = vmatpush.bf16.msrb.mxu2 %v977_v40  ;;  %v1089_v40 = vor.u32 %v1164_v39, %v1088_v37 }
  0x9a   :  { %612 = vmatpush.bf16.msrb.mxu3 %v1009_v25 }
  0x9b   :  { %585 = vmatpush.bf16.msrb.mxu1 %v949_v23  ;;  %v1044_v23 = vld [vmem:[#allocation5 + $0xd8] sm:$0xf] }
  0x9c   :  { %v1045_v25 = vor.u32 %v1153_v24, %v1044_v23 }
  0x9d   :  { %600 = vmatpush.bf16.msrb.mxu2 %v973_v49 }
  0x9e   :  { %613 = vmatpush.bf16.msrb.mxu3 %v1005_v34  ;;  %694 = vmatpush.bf16.msra.mxu0 %v1045_v25  ;;  %v1033_v34 = vor.u32 %v1150_v33, %v1032_v32 }
  0x9f   :  { %586 = vmatpush.bf16.msrb.mxu1 %v945_v38  ;;  %v1093_v38 = vor.u32 %v1165_v36, %v1092_v35 }
  0xa1   :  { %601 = vmatpush.bf16.msrb.mxu2 %v969_v55  ;;  %v1073_v55 = vor.u32 %v1160_v51, %v1072_v50 }
  0xa2   :  { %614 = vmatpush.bf16.msrb.mxu3 %v1001_v43  ;;  %v1085_v43 = vor.u32 %v1163_v42, %v1084_v41 }
  0xa3   :  { %587 = vmatpush.bf16.msrb.mxu1 %v941_v47  ;;  %v1076_v47 = vld [vmem:[#allocation5 + $0xdc] sm:$0xf] }
  0xa4   :  { %v1077_v49 = vor.u32 %v1161_v48, %v1076_v47 }
  0xa7   :  { %588 = vmatpush.bf16.msrb.mxu1 %v937_v53  ;;  %v1174_v53 = vld [vmem:[#allocation7 + $0x5] ss:$0 sm:$0xff] }
  0xab   :  { %773 = vmatpush.bf16.msra.mxu1 %v1093_v38 }
  0xaf   :  { %774 = vmatpush.bf16.msra.mxu1 %v1089_v40 }
  0xb3   :  { %775 = vmatpush.bf16.msra.mxu1 %v1085_v43 }
  0xb7   :  { %776 = vmatpush.bf16.msra.mxu1 %v1081_v46 }
  0xbb   :  { %777 = vmatpush.bf16.msra.mxu1 %v1077_v49 }
  0xbf   :  { %778 = vmatpush.bf16.msra.mxu1 %v1073_v55 }
  0xc3   :  { %779 = vmatpush.bf16.msra.mxu1 %v1069_v3 }
 0x114   :  { %v166_v27 = vpop.f32.mrf.mxu1 }
 0x115   :  { %v167_v28 = vadd.f32 %v1173_v26, %v166_v27  ;;  %v1040_v26 = vld [vmem:[#allocation5 + $0x98] sm:$0xf] }
 0x116   :  { %v1152_v27 = vld [vmem:[#allocation5 + $0xb4] sm:$0xf0] }
 0x117   :  { %v170_v29 = vmax.f32 %v167_v28, 0.0  ;;  %v1041_v28 = vor.u32 %v1152_v27, %v1040_v26 }
 0x119   :  { %v204_v30 = vpack.c.bf16 %v170_v29, %v170_v29  ;;  %695 = vmatpush.bf16.msra.mxu0 %v1041_v28  ;;  %v1036_v29 = vld [vmem:[#allocation5 + $0x58] sm:$0xf] }
 0x11b   :  { %348 = vmatmul.bf16.vlgmr.msra.gmra.mxu2 %v204_v30  ;;  %361 = vmatmul.bf16.vlgmr.msra.gmra.mxu3 %v204_v30 }
 0x11c   :  { %374 = vmatmul.bf16.vlgmr.msrb.gmra.mxu0 %v204_v30  ;;  %v168_v31 = vpop.f32.mrf.mxu1  ;;  %v1151_v30 = vld [vmem:[#allocation5 + $0x74] sm:$0xf0] }
 0x11d   :  { %v1037_v31 = vor.u32 %v1151_v30, %v1036_v29 }
 0x11f   :  { %696 = vmatpush.bf16.msra.mxu0 %v1037_v31 }
 0x123   :  { %697 = vmatpush.bf16.msra.mxu0 %v1033_v34 }
 0x199   :  { %v375_v6 = vpop.f32.mrf.mxu0 }
 0x19a   :  { %v376_v7 = vadd.f32 %v375_v6, %v208_v5  ;;  %v1158_v5 = vld [vmem:[#allocation5 + $0x38] sm:$0xf0] }
 0x19b   :  { %v1065_v6 = vor.u32 %v1158_v5, %v1064_v4 }
 0x19c   :  { %v381_v10 = vmax.f32 %v376_v7, 0.0  ;;  %v1175_v7 = vld [vmem:[#allocation7 + $0x6] ss:$0 sm:$0xff] }
 0x19d   :  { %780 = vmatpush.bf16.msra.mxu1 %v1065_v6 }
 0x19e   :  { %v433_v11 = vpack.c.bf16 %v381_v10, %v381_v10  ;;  %v349_v12 = vpop.f32.mrf.mxu2  ;;  %v362_v13 = vpop.f32.mrf.mxu3 }
 0x19f   :  { %v350_v14 = vadd.f32 %v349_v12, %v206_v8  ;;  %v363_v15 = vadd.f32 %v362_v13, %v207_v9  ;;  %v1176_v13 = vld [vmem:[#allocation7 + $0x7] ss:$0 sm:$0xff] }
 0x1a0   :  { %615 = vmatmul.bf16.vlgmr.msrb.gmra.mxu3 %v433_v11 }
 0x1a1   :  { %v379_v16 = vmax.f32 %v350_v14, 0.0  ;;  %v380_v17 = vmax.f32 %v363_v15, 0.0  ;;  %v377_v18 = vpop.f32.mrf.mxu0 }
 0x1a3   :  { %v431_v19 = vpack.c.bf16 %v379_v16, %v379_v16  ;;  %v432_v20 = vpack.c.bf16 %v380_v17, %v380_v17 }
 0x1a5   :  { %589 = vmatmul.bf16.vlgmr.msrb.gmra.mxu1 %v431_v19  ;;  %602 = vmatmul.bf16.vlgmr.msrb.gmra.mxu2 %v432_v20 }
 0x1a6   :  { %v351_v21 = vpop.f32.mrf.mxu2  ;;  %v364_v22 = vpop.f32.mrf.mxu3 }
 0x222   :  { %v590_v52 = vpop.f32.mrf.mxu1 }
 0x223   :  { %v616_v54 = vpop.f32.mrf.mxu3  ;;  %v591_v56 = vadd.f32 %v1174_v53, %v590_v52 }
 0x228   :  { %v603_v57 = vpop.f32.mrf.mxu2 }
 0x229   :  { %v604_v58 = vadd.f32 %v603_v57, %v591_v56 }
 0x22a   :  { %v592_v59 = vpop.f32.mrf.mxu1 }
 0x22b   :  { %v617_v60 = vadd.f32 %v616_v54, %v604_v58  ;;  %v618_v61 = vpop.f32.mrf.mxu3 }
 0x22d   :  { %v620_v62 = vmax.f32 %v617_v60, 0.0 }
 0x22f   :  { %v638_v63 = vpack.c.bf16 %v620_v62, %v620_v62 }
 0x230   :  { %v605_v0 = vpop.f32.mrf.mxu2 }
 0x231   :  { %698 = vmatmul.bf16.vlgmr.msra.gmra.mxu0 %v638_v63 }
 0x2ae   :  { %v699_v8 = vpop.f32.mrf.mxu0 }
 0x2af   :  { %v700_v9 = vadd.f32 %v1175_v7, %v699_v8 }
 0x2b1   :  { %v703_v10 = vmax.f32 %v700_v9, 0.0 }
 0x2b3   :  { %v721_v11 = vpack.c.bf16 %v703_v10, %v703_v10 }
 0x2b5   :  { %781 = vmatmul.bf16.vlgmr.msra.gmra.mxu1 %v721_v11 }
 0x2b6   :  { %v701_v12 = vpop.f32.mrf.mxu0 }
 0x332   :  { %v782_v14 = vpop.f32.mrf.mxu1 }
 0x333   :  { %v783_v15 = vadd.f32 %v1176_v13, %v782_v14 }
 0x335   :  { %786 = vst [vmem:[#allocation8] sm:$0xff] %v783_v15 }
 0x336   :  { %797 = dma.vmem_to_hbm [thread:$0]  %s793_s2, 128, %s795_s30, [#allocation4]  }
 0x33a   :  { %v784_v16 = vpop.f32.mrf.mxu1 }
 0x33b   :  { %1277 = dma.done.wait [#allocation4], 128  }
 0x33c   :  { %1278 = vsyncadd [#allocation4], 4294967168 }
 0x33d   :  { %802 = vsyncpa [#allocation3], 1 }
 0x33e   :  { %803 = vsyncpa [#allocation6], 1 }
 0x33f   :  { %804 = vsyncpa [#allocation4], 1 }

</bundles_post_ra>
